<compile_context>
chip_gen: v7x
topology: tpu7x:2x2x1
jax: 0.10.0
libtpu: 0.0.40
codegen_flags: <defaults>
</compile_context>

<pallas_src>
import math

import jax
import jax.numpy as jnp
from jax.experimental import pallas as pl
from jax.experimental.pallas import tpu as pltpu

# ---------------- configuration (small, deterministic) ----------------
BATCH = 256            # rows; total data is still only a few KB
TILE_B = 128           # batch rows per grid step
IN_FEATURES = 4
OUT_FEATURES = 4
HIDDEN = 32
CONTEXT = 8
NUM_BLOCKS = 2
XC = IN_FEATURES + CONTEXT

# ---- packed weight slab layout (bf16, shape (WPACK_ROWS, WPACK_COLS)) ----
WPACK_COLS = NUM_BLOCKS * HIDDEN                 # 64
ROW_WIN = 0                                      # initial layer  (XC, HIDDEN)
ROW_WC = 16                                      # context gates  (CONTEXT, NB*HIDDEN)
ROW_BLK = 32                                     # block linears: 2*NB chunks of (H, H)
ROW_WF = ROW_BLK + 2 * NUM_BLOCKS * HIDDEN       # final layer    (HIDDEN, OUT)
WPACK_ROWS = ROW_WF + HIDDEN                     # 192

# ---- packed bias slab layout (f32, shape (BPACK_ROWS, WPACK_COLS)) ----
B_BI = 0                                         # initial bias          (HIDDEN)
B_B0 = 1                                         # block linear0 biases  (NB rows)
B_B1 = 1 + NUM_BLOCKS                            # block linear1 biases  (NB rows)
B_BC = 1 + 2 * NUM_BLOCKS                        # all context biases    (NB*HIDDEN)
B_BF = 2 + 2 * NUM_BLOCKS                        # final bias            (OUT)
BPACK_ROWS = 8
BPACK_COLS = WPACK_COLS


# ---------------- Pallas kernel ----------------
def residual_net_kernel(xc_ref, wpack_ref, bpack_ref, o_ref):
    xc = xc_ref[...]                              # (TB, IN+CTX) bf16
    c = xc[:, IN_FEATURES:]                       # (TB, CTX)    bf16

    # initial_layer(cat(x, context)) as a single fused matmul
    w_in = wpack_ref[ROW_WIN:ROW_WIN + XC, :HIDDEN]
    h = (jnp.dot(xc, w_in, preferred_element_type=jnp.float32)
         + bpack_ref[B_BI:B_BI + 1, :HIDDEN])      # (TB, H) f32

    # context gates for all blocks, hoisted off the h dependency chain
    wc_all = wpack_ref[ROW_WC:ROW_WC + CONTEXT, :]                  # (CTX, NB*H)
    g_all = (jnp.dot(c, wc_all, preferred_element_type=jnp.float32)
             + bpack_ref[B_BC:B_BC + 1, :])                          # (TB, NB*H)
    gate = pl.reciprocal(1.0 + jnp.exp(-g_all), approx=True)        # sigmoid (EUP)

    for blk in range(NUM_BLOCKS):
        # ResidualBlock.forward (use_batch_norm=False, dropout p=0 -> identity)
        r0 = ROW_BLK + (2 * blk) * HIDDEN
        r1 = ROW_BLK + (2 * blk + 1) * HIDDEN
        t = jnp.maximum(h, 0.0).astype(jnp.bfloat16)                 # relu
        t = (jnp.dot(t, wpack_ref[r0:r0 + HIDDEN, :HIDDEN],
                     preferred_element_type=jnp.float32)
             + bpack_ref[B_B0 + blk:B_B0 + blk + 1, :HIDDEN])        # linear_layers[0]
        t = jnp.maximum(t, 0.0).astype(jnp.bfloat16)                 # relu
        # TODO(synk): dropout_probability=0.0 -> no-op; non-zero dropout not emitted.
        t = (jnp.dot(t, wpack_ref[r1:r1 + HIDDEN, :HIDDEN],
                     preferred_element_type=jnp.float32)
             + bpack_ref[B_B1 + blk:B_B1 + blk + 1, :HIDDEN])        # linear_layers[1]
        t = t * gate[:, blk * HIDDEN:(blk + 1) * HIDDEN]             # F.glu(cat(t,g))
        h = h + t                                                    # residual add

    w_f = wpack_ref[ROW_WF:ROW_WF + HIDDEN, :OUT_FEATURES]
    o_ref[...] = (jnp.dot(h.astype(jnp.bfloat16), w_f,
                          preferred_element_type=jnp.float32)
                  + bpack_ref[B_BF:B_BF + 1, :OUT_FEATURES]).astype(o_ref.dtype)


# ---------------- wrapper ----------------
def residual_net_forward(x, context, packed):
    B = x.shape[0]
    assert B % TILE_B == 0, "demo wrapper assumes batch divisible by TILE_B"
    xc = jnp.concatenate([x, context], axis=1).astype(jnp.bfloat16)   # (B, IN+CTX)

    return pl.pallas_call(
        residual_net_kernel,
        out_shape=jax.ShapeDtypeStruct((B, OUT_FEATURES), jnp.float32),
        grid_spec=pltpu.PrefetchScalarGridSpec(
            num_scalar_prefetch=0,
            grid=(B // TILE_B,),
            in_specs=[
                pl.BlockSpec((TILE_B, XC), lambda i: (i, 0)),
                pl.BlockSpec((WPACK_ROWS, WPACK_COLS), lambda i: (0, 0)),
                pl.BlockSpec((BPACK_ROWS, BPACK_COLS), lambda i: (0, 0)),
            ],
            out_specs=pl.BlockSpec((TILE_B, OUT_FEATURES), lambda i: (i, 0)),
        ),
        compiler_params=pltpu.CompilerParams(
            dimension_semantics=("parallel",)),
    )(xc, packed["wpack"], packed["bpack"])


# ---------------- deterministic parameter init ----------------
def _linear_init(key, fan_in, fan_out, bound=None):
    """Mimics nn.Linear default init (U(-1/sqrt(fan_in), ...)); weight is (out, in)."""
    kw, kb = jax.random.split(key)
    if bound is None:
        bound = 1.0 / math.sqrt(fan_in)
    w = jax.random.uniform(kw, (fan_out, fan_in), jnp.float32, -bound, bound)
    b = jax.random.uniform(kb, (fan_out,), jnp.float32, -bound, bound)
    return w, b


def make_params(key):
    keys = jax.random.split(key, 2 + 3 * NUM_BLOCKS)
    ki = iter(keys)

    # initial_layer: Linear(IN + CONTEXT, HIDDEN)
    wi, bi = _linear_init(next(ki), XC, HIDDEN)

    blocks = []
    for _ in range(NUM_BLOCKS):
        w0, b0 = _linear_init(next(ki), HIDDEN, HIDDEN)
        # zero_initialization=True: last linear of block ~ U(-1e-3, 1e-3)
        w1, b1 = _linear_init(next(ki), HIDDEN, HIDDEN, bound=1e-3)
        wc, bc = _linear_init(next(ki), CONTEXT, HIDDEN)
        blocks.append((w0, b0, w1, b1, wc, bc))

    # final_layer: Linear(HIDDEN, OUT)
    wf, bf = _linear_init(next(ki), HIDDEN, OUT_FEATURES)

    # Quantize weights to bf16 once (MXU native); keep f32-promoted copies for reference.
    q = lambda w: w.astype(jnp.bfloat16).astype(jnp.float32)
    wi_q, wf_q = q(wi), q(wf)
    blocks_q = [(q(w0), b0, q(w1), b1, q(wc), bc) for (w0, b0, w1, b1, wc, bc) in blocks]

    # ---- pack all matmul weights into one bf16 slab ----
    wpack = jnp.zeros((WPACK_ROWS, WPACK_COLS), jnp.float32)
    wpack = wpack.at[ROW_WIN:ROW_WIN + XC, :HIDDEN].set(wi_q.T)
    wc_all = jnp.concatenate([b[4].T for b in blocks_q], axis=1)     # (CTX, NB*H)
    wpack = wpack.at[ROW_WC:ROW_WC + CONTEXT, :].set(wc_all)
    for blk, (w0q, _, w1q, _, _, _) in enumerate(blocks_q):
        r0 = ROW_BLK + (2 * blk) * HIDDEN
        r1 = ROW_BLK + (2 * blk + 1) * HIDDEN
        wpack = wpack.at[r0:r0 + HIDDEN, :HIDDEN].set(w0q.T)
        wpack = wpack.at[r1:r1 + HIDDEN, :HIDDEN].set(w1q.T)
    wpack = wpack.at[ROW_WF:ROW_WF + HIDDEN, :OUT_FEATURES].set(wf_q.T)

    # ---- pack all biases into one f32 slab ----
    bpack = jnp.zeros((BPACK_ROWS, BPACK_COLS), jnp.float32)
    bpack = bpack.at[B_BI, :HIDDEN].set(bi)
    for blk, (_, b0, _, b1, _, bc) in enumerate(blocks_q):
        bpack = bpack.at[B_B0 + blk, :HIDDEN].set(b0)
        bpack = bpack.at[B_B1 + blk, :HIDDEN].set(b1)
        bpack = bpack.at[B_BC, blk * HIDDEN:(blk + 1) * HIDDEN].set(bc)
    bpack = bpack.at[B_BF, :OUT_FEATURES].set(bf)

    packed = {"wpack": wpack.astype(jnp.bfloat16), "bpack": bpack}
    ref = {"wi": wi_q, "bi": bi, "blocks": blocks_q, "wf": wf_q, "bf": bf}
    return packed, ref


# ---------------- pure-JAX reference (mirrors the PyTorch forward) ----------------
def reference_forward(x, context, ref):
    # Match the kernel's one-time bf16 rounding of inputs/weights; math in f32.
    xr = x.astype(jnp.bfloat16).astype(jnp.float32)
    cr = context.astype(jnp.bfloat16).astype(jnp.float32)
    h = jnp.concatenate([xr, cr], axis=1) @ ref["wi"].T + ref["bi"]
    for (w0, b0, w1, b1, wc, bc) in ref["blocks"]:
        t = jax.nn.relu(h)
        t = t @ w0.T + b0
        t = jax.nn.relu(t)
        t = t @ w1.T + b1
        g = cr @ wc.T + bc
        t = t * jax.nn.sigmoid(g)
        h = h + t
    return h @ ref["wf"].T + ref["bf"]


if __name__ == "__main__":
    key = jax.random.PRNGKey(0)
    kx, kc, kp = jax.random.split(key, 3)

    x = jax.random.normal(kx, (BATCH, IN_FEATURES), jnp.float32)
    context = jax.random.normal(kc, (BATCH, CONTEXT), jnp.float32)
    packed, ref_params = make_params(kp)

    out = residual_net_forward(x, context, packed)
    out = jax.block_until_ready(out)

    ref = reference_forward(x, context, ref_params)
    assert out.shape == (BATCH, OUT_FEATURES)
    assert jnp.allclose(out, ref, atol=1e-2, rtol=1e-2), "mismatch vs JAX reference"

    print("KERNEL_OK")
</pallas_src>

<mosaic_0001>
module attributes {stable_mosaic.version = 11 : i64} {
  func.func @residual_net_kernel(%arg0: i32, %arg1: memref<128x12xbf16, #tpu.memory_space<vmem>>, %arg2: memref<192x64xbf16, #tpu.memory_space<vmem>>, %arg3: memref<8x64xf32, #tpu.memory_space<vmem>>, %arg4: memref<128x4xf32, #tpu.memory_space<vmem>>) attributes {dimension_semantics = [#tpu.dimension_semantics<parallel>], iteration_bounds = array<i64: 2>, scalar_prefetch = 0 : i64, scratch_operands = 0 : i64, tpu.core_type = #tpu.core_type<tc>, window_params = [{transform_indices = @transform_0, window_bounds = array<i64: 128, 12>}, {pipeline_mode = #tpu.pipeline_mode<synchronous>, transform_indices = @transform_1, window_bounds = array<i64: 192, 64>}, {pipeline_mode = #tpu.pipeline_mode<synchronous>, transform_indices = @transform_2, window_bounds = array<i64: 8, 64>}, {transform_indices = @transform_3, window_bounds = array<i64: 128, 4>}]} {
    %c0 = arith.constant 0 : index
    %c0_0 = arith.constant 0 : index
    %0 = vector.load %arg1[%c0, %c0_0] : memref<128x12xbf16, #tpu.memory_space<vmem>>, vector<128x12xbf16>
    %1 = vector.extract_strided_slice %0 {offsets = [0, 4], sizes = [128, 8], strides = [1, 1]} : vector<128x12xbf16> to vector<128x8xbf16>
    %c0_1 = arith.constant 0 : index
    %c0_2 = arith.constant 0 : index
    %2 = vector.load %arg2[%c0_1, %c0_2] : memref<192x64xbf16, #tpu.memory_space<vmem>>, vector<12x32xbf16>
    %cst = arith.constant dense<0.000000e+00> : vector<128x32xf32>
    %3 = tpu.matmul %0, %2, %cst {dimension_numbers = #tpu.dot_dimension_numbers<[1], [0], [0], [1], [0, 0, 1, 1], [], []>} : vector<128x12xbf16>, vector<12x32xbf16>, vector<128x32xf32> -> vector<128x32xf32>
    %c0_3 = arith.constant 0 : index
    %c0_4 = arith.constant 0 : index
    %4 = vector.load %arg3[%c0_3, %c0_4] : memref<8x64xf32, #tpu.memory_space<vmem>>, vector<1x32xf32>
    %5 = vector.broadcast %4 : vector<1x32xf32> to vector<128x32xf32>
    %6 = arith.addf %3, %5 : vector<128x32xf32>
    %c16 = arith.constant 16 : index
    %c0_5 = arith.constant 0 : index
    %7 = vector.load %arg2[%c16, %c0_5] : memref<192x64xbf16, #tpu.memory_space<vmem>>, vector<8x64xbf16>
    %cst_6 = arith.constant dense<0.000000e+00> : vector<128x64xf32>
    %8 = tpu.matmul %1, %7, %cst_6 {dimension_numbers = #tpu.dot_dimension_numbers<[1], [0], [0], [1], [0, 0, 1, 1], [], []>} : vector<128x8xbf16>, vector<8x64xbf16>, vector<128x64xf32> -> vector<128x64xf32>
    %c5 = arith.constant 5 : index
    %c0_7 = arith.constant 0 : index
    %9 = vector.load %arg3[%c5, %c0_7] : memref<8x64xf32, #tpu.memory_space<vmem>>, vector<1x64xf32>
    %10 = vector.broadcast %9 : vector<1x64xf32> to vector<128x64xf32>
    %11 = arith.addf %8, %10 : vector<128x64xf32>
    %cst_8 = arith.constant 0.000000e+00 : f32
    %12 = vector.broadcast %cst_8 : f32 to vector<128x64xf32>
    %13 = arith.subf %12, %11 : vector<128x64xf32>
    %14 = math.exp %13 : vector<128x64xf32>
    %cst_9 = arith.constant 1.000000e+00 : f32
    %15 = vector.broadcast %cst_9 : f32 to vector<128x64xf32>
    %16 = arith.addf %15, %14 : vector<128x64xf32>
    %17 = tpu.reciprocal %16 {approx = true} : vector<128x64xf32> -> vector<128x64xf32>
    %cst_10 = arith.constant 0.000000e+00 : f32
    %18 = vector.broadcast %cst_10 : f32 to vector<128x32xf32>
    %19 = arith.maximumf %6, %18 : vector<128x32xf32>
    %20 = arith.truncf %19 : vector<128x32xf32> to vector<128x32xbf16>
    %c32 = arith.constant 32 : index
    %c0_11 = arith.constant 0 : index
    %21 = vector.load %arg2[%c32, %c0_11] : memref<192x64xbf16, #tpu.memory_space<vmem>>, vector<32x32xbf16>
    %cst_12 = arith.constant dense<0.000000e+00> : vector<128x32xf32>
    %22 = tpu.matmul %20, %21, %cst_12 {dimension_numbers = #tpu.dot_dimension_numbers<[1], [0], [0], [1], [0, 0, 1, 1], [], []>} : vector<128x32xbf16>, vector<32x32xbf16>, vector<128x32xf32> -> vector<128x32xf32>
    %c1 = arith.constant 1 : index
    %c0_13 = arith.constant 0 : index
    %23 = vector.load %arg3[%c1, %c0_13] : memref<8x64xf32, #tpu.memory_space<vmem>>, vector<1x32xf32>
    %24 = vector.broadcast %23 : vector<1x32xf32> to vector<128x32xf32>
    %25 = arith.addf %22, %24 : vector<128x32xf32>
    %cst_14 = arith.constant 0.000000e+00 : f32
    %26 = vector.broadcast %cst_14 : f32 to vector<128x32xf32>
    %27 = arith.maximumf %25, %26 : vector<128x32xf32>
    %28 = arith.truncf %27 : vector<128x32xf32> to vector<128x32xbf16>
    %c64 = arith.constant 64 : index
    %c0_15 = arith.constant 0 : index
    %29 = vector.load %arg2[%c64, %c0_15] : memref<192x64xbf16, #tpu.memory_space<vmem>>, vector<32x32xbf16>
    %cst_16 = arith.constant dense<0.000000e+00> : vector<128x32xf32>
    %30 = tpu.matmul %28, %29, %cst_16 {dimension_numbers = #tpu.dot_dimension_numbers<[1], [0], [0], [1], [0, 0, 1, 1], [], []>} : vector<128x32xbf16>, vector<32x32xbf16>, vector<128x32xf32> -> vector<128x32xf32>
    %c3 = arith.constant 3 : index
    %c0_17 = arith.constant 0 : index
    %31 = vector.load %arg3[%c3, %c0_17] : memref<8x64xf32, #tpu.memory_space<vmem>>, vector<1x32xf32>
    %32 = vector.broadcast %31 : vector<1x32xf32> to vector<128x32xf32>
    %33 = arith.addf %30, %32 : vector<128x32xf32>
    %34 = vector.extract_strided_slice %17 {offsets = [0, 0], sizes = [128, 32], strides = [1, 1]} : vector<128x64xf32> to vector<128x32xf32>
    %35 = arith.mulf %33, %34 : vector<128x32xf32>
    %36 = arith.addf %6, %35 : vector<128x32xf32>
    %cst_18 = arith.constant 0.000000e+00 : f32
    %37 = vector.broadcast %cst_18 : f32 to vector<128x32xf32>
    %38 = arith.maximumf %36, %37 : vector<128x32xf32>
    %39 = arith.truncf %38 : vector<128x32xf32> to vector<128x32xbf16>
    %c96 = arith.constant 96 : index
    %c0_19 = arith.constant 0 : index
    %40 = vector.load %arg2[%c96, %c0_19] : memref<192x64xbf16, #tpu.memory_space<vmem>>, vector<32x32xbf16>
    %cst_20 = arith.constant dense<0.000000e+00> : vector<128x32xf32>
    %41 = tpu.matmul %39, %40, %cst_20 {dimension_numbers = #tpu.dot_dimension_numbers<[1], [0], [0], [1], [0, 0, 1, 1], [], []>} : vector<128x32xbf16>, vector<32x32xbf16>, vector<128x32xf32> -> vector<128x32xf32>
    %c2 = arith.constant 2 : index
    %c0_21 = arith.constant 0 : index
    %42 = vector.load %arg3[%c2, %c0_21] : memref<8x64xf32, #tpu.memory_space<vmem>>, vector<1x32xf32>
    %43 = vector.broadcast %42 : vector<1x32xf32> to vector<128x32xf32>
    %44 = arith.addf %41, %43 : vector<128x32xf32>
    %cst_22 = arith.constant 0.000000e+00 : f32
    %45 = vector.broadcast %cst_22 : f32 to vector<128x32xf32>
    %46 = arith.maximumf %44, %45 : vector<128x32xf32>
    %47 = arith.truncf %46 : vector<128x32xf32> to vector<128x32xbf16>
    %c128 = arith.constant 128 : index
    %c0_23 = arith.constant 0 : index
    %48 = vector.load %arg2[%c128, %c0_23] : memref<192x64xbf16, #tpu.memory_space<vmem>>, vector<32x32xbf16>
    %cst_24 = arith.constant dense<0.000000e+00> : vector<128x32xf32>
    %49 = tpu.matmul %47, %48, %cst_24 {dimension_numbers = #tpu.dot_dimension_numbers<[1], [0], [0], [1], [0, 0, 1, 1], [], []>} : vector<128x32xbf16>, vector<32x32xbf16>, vector<128x32xf32> -> vector<128x32xf32>
    %c4 = arith.constant 4 : index
    %c0_25 = arith.constant 0 : index
    %50 = vector.load %arg3[%c4, %c0_25] : memref<8x64xf32, #tpu.memory_space<vmem>>, vector<1x32xf32>
    %51 = vector.broadcast %50 : vector<1x32xf32> to vector<128x32xf32>
    %52 = arith.addf %49, %51 : vector<128x32xf32>
    %53 = vector.extract_strided_slice %17 {offsets = [0, 32], sizes = [128, 32], strides = [1, 1]} : vector<128x64xf32> to vector<128x32xf32>
    %54 = arith.mulf %52, %53 : vector<128x32xf32>
    %55 = arith.addf %36, %54 : vector<128x32xf32>
    %c160 = arith.constant 160 : index
    %c0_26 = arith.constant 0 : index
    %56 = vector.load %arg2[%c160, %c0_26] : memref<192x64xbf16, #tpu.memory_space<vmem>>, vector<32x4xbf16>
    %57 = arith.truncf %55 : vector<128x32xf32> to vector<128x32xbf16>
    %cst_27 = arith.constant dense<0.000000e+00> : vector<128x4xf32>
    %58 = tpu.matmul %57, %56, %cst_27 {dimension_numbers = #tpu.dot_dimension_numbers<[1], [0], [0], [1], [0, 0, 1, 1], [], []>} : vector<128x32xbf16>, vector<32x4xbf16>, vector<128x4xf32> -> vector<128x4xf32>
    %c6 = arith.constant 6 : index
    %c0_28 = arith.constant 0 : index
    %59 = vector.load %arg3[%c6, %c0_28] : memref<8x64xf32, #tpu.memory_space<vmem>>, vector<1x4xf32>
    %60 = vector.broadcast %59 : vector<1x4xf32> to vector<128x4xf32>
    %61 = arith.addf %58, %60 : vector<128x4xf32>
    %c0_29 = arith.constant 0 : index
    %c0_30 = arith.constant 0 : index
    %62 = vector.load %arg4[%c0_29, %c0_30] : memref<128x4xf32, #tpu.memory_space<vmem>>, vector<128x4xf32>
    tpu.vector_store %arg4[%c0_29, %c0_30], %61 {strides = array<i32>} : memref<128x4xf32, #tpu.memory_space<vmem>>, vector<128x4xf32>,
    return
  }
  func.func @transform_0(%arg0: i32) -> (i32, i32) {
    %c0_i32 = arith.constant 0 : i32
    %c0_i32_0 = arith.constant 0 : i32
    return %arg0, %c0_i32 : i32, i32
  }
  func.func @transform_1(%arg0: i32) -> (i32, i32) {
    %c0_i32 = arith.constant 0 : i32
    %c0_i32_0 = arith.constant 0 : i32
    %c0_i32_1 = arith.constant 0 : i32
    return %c0_i32, %c0_i32_0 : i32, i32
  }
  func.func @transform_2(%arg0: i32) -> (i32, i32) {
    %c0_i32 = arith.constant 0 : i32
    %c0_i32_0 = arith.constant 0 : i32
    %c0_i32_1 = arith.constant 0 : i32
    return %c0_i32, %c0_i32_0 : i32, i32
  }
  func.func @transform_3(%arg0: i32) -> (i32, i32) {
    %c0_i32 = arith.constant 0 : i32
    %c0_i32_0 = arith.constant 0 : i32
    return %arg0, %c0_i32 : i32, i32
  }
}

</mosaic_0001>

<bundles_post_ra>
// kernel: tpu_custom_call.1
= control target key start
LH: loop header
LB: loop body
LE: loop exit
PB: predicated region body
PF: predicated region fallthrough
CT: control target
= control target key end

     0   :  { %s2038_s12 = smov 0   ;;  %s2490_s0 = inlined_call_operand.vmem [shape: bf16[256,12], index: 0, kind: input, shape index: {}]   ;;  %s2491_s1 = inlined_call_operand.vmem [shape: bf16[192,64], index: 1, kind: input, shape index: {}]   ;;  %s2492_s2 = inlined_call_operand.vmem [shape: f32[8,64], index: 2, kind: input, shape index: {}]   ;;  %s2493_s3 = inlined_call_operand.vmem [shape: f32[256,4], index: 3, kind: output, shape index: {}]  }
   0x1 LB: > { %s1613_s13 = sadd.s32 4294967295, %s2014_s12   ;;  %p1617_p0 = scmp.ge.s32.totalorder %s2014_s12, 1  ;;  %s2014_s12 = sphi %s2038_s12, %s13_s12  }
   0x2   : > { %p138_p1 = scmp.lt.s32.totalorder %s2014_s12, 3 }
   0x4   : > { %p139_p2 = pnand %p1617_p0, %p138_p1 }
   0x5   : > { %v1925_v0 = vld [vmem:[%s2491_s1] sm:$0x3f] (!%p139_p2)   ;;  %vm268_vm0 = vcmask (!%p139_p2), 1045504   ;;  %s1618_s16 = sshll.u32 (!%p139_p2), %s1613_s13, 4  ;;  %v1934_v1 = vld [vmem:[%s2491_s1 + $0x10] sm:$0xff] (!%p139_p2)   ;;  %vm243_vm1 = vcmask (!%p139_p2), 97280  }
   0x6   : > { %142 = sbr.rel (%p139_p2) target bundleno = 1376 (0x560), region = 32  ;;  %1912 = vmatprep.subr.msk.bf16.mxu0 (!%p139_p2), %vm268_vm0, %v1925_v0  ;;  %v270_v2 = vsel (!%p139_p2), %vm268_vm0, %v1925_v0, 0  ;;  %p163_p3 = scmp.lt.s32.totalorder (!%p139_p2), %s1618_s16, 31  ;;  %1913 = vmatprep.subr.msk.bf16.mxu1 (!%p139_p2), %vm268_vm0, %v1925_v0  ;;  %v1935_v11 = vld [vmem:[%s2491_s1 + $0x18] sm:$0xff] (!%p139_p2)   ;;  %v369_v12 = vld [vmem:[%s2491_s1 + $0x8] sm:$0xf] (!%p139_p2) }
   0x7   : > { %1775 = vmatpush3.bf16.msra.mxu0 (!%p139_p2), %v270_v2  ;;  %1911 = vmatpush3.bf16.msra.mxu1 (!%p139_p2), %v270_v2  ;;  %vm416_vm2 = vcmask (!%p139_p2), 1043456   ;;  %v2075_v13 = vld [vmem:[%s2491_s1 + $0x20] sm:$0xff] (!%p139_p2)   ;;  %s2016_s29 = smov (!%p139_p2), 124   ;;  %vm642_vm3 = vcmask (!%p139_p2), 261120   ;;  %vm391_vm4 = vcmask (!%p139_p2), 64512   ;;  %s2017_s17 = smov (!%p139_p2), 96  }
   0x8   : > { %1810 = vmatprep.subr.bf16.mxu0 (!%p139_p2), %v1934_v1  ;;  %v418_v14 = vsel (!%p139_p2), %vm416_vm2, %v369_v12, 0  ;;  %1914 = vmatprep.subr.msk.bf16.mxu1 (!%p139_p2), %vm416_vm2, %v369_v12  ;;  %v1622_v15 = vld [vmem:[%s2492_s2] ss:$0 sm:$0xff] (!%p139_p2)  ;;  %vm1540_vm5 = vcmask (!%p139_p2), 31744  }
   0xd   : > { %s2495_s16 = smov (!%p163_p3, %s1618_s16), 31 }
   0xe   : > { %s1619_s19 = sshll.u32 %s2495_s16, 2  ;;  %s1621_s5 = sshll.u32 %s2495_s16, 3 }
   0xf   : > { %s166_s22 = scalar_lea.vmem %s2490_s0, %s1619_s19  ;;  %s2453_s10 = scalar_lea.vmem %s2493_s3, %s1621_s5 }
  0x10   : > { %v1926_v3 = vld [vmem:[%s166_s22] sm:$0xff]   ;;  %v1927_v4 = vld [vmem:[%s166_s22 + $0x8] sm:$0xff]   ;;  %v1928_v5 = vld [vmem:[%s166_s22 + $0x10] sm:$0xff]  }
  0x11   : > { %1776 = vmatprep.mubr.msk.bf16.mxu0 %vm243_vm1, %v1926_v3  ;;  %v1930_v6 = vld [vmem:[%s166_s22 + $0x20] sm:$0xff]   ;;  %v1931_v7 = vld [vmem:[%s166_s22 + $0x28] sm:$0xff]   ;;  %v1932_v8 = vld [vmem:[%s166_s22 + $0x30] sm:$0xff]   ;;  %375 = vrot.lane.b32.xlu0 %v1926_v3, %s2016_s29 }
  0x12   : > { %1777 = vmatmul.mubr.msk.bf16.vlgmr.msra.gmra.mrb[0].mxu0 %vm243_vm1, %v1927_v4  ;;  %1784 = vmatprep.mubr.msk.bf16.mxu1 %vm243_vm1, %v1930_v6  ;;  %v1929_v9 = vld [vmem:[%s166_s22 + $0x18] sm:$0xff]  }
  0x13   : > { %1780 = vmatprep.mubr.msk.bf16.mxu0 %vm243_vm1, %v1928_v5  ;;  %1811 = vmatpush3.bf16.msra.mxu0 %v1934_v1  ;;  %v1933_v10 = vld [vmem:[%s166_s22 + $0x38] sm:$0xff]  }
  0x14   : > { %1785 = vmatmul.mubr.msk.bf16.vlgmr.msra.gmra.mrb[0].mxu1 %vm243_vm1, %v1931_v7  ;;  %1812 = vmatprep.subr.bf16.mxu0 %v1935_v11 }
  0x15   : > { %1788 = vmatprep.mubr.msk.bf16.mxu1 %vm243_vm1, %v1932_v8  ;;  %379 = vrot.lane.b32.xlu1 %v1928_v5, %s2016_s29 }
  0x16   : > { %1793 = vmatpush3.bf16.msra.mxu1 %v418_v14  ;;  %377 = vrot.lane.b32.xlu0 %v1927_v4, %s2016_s29 }
  0x17   : > { %1813 = vmatpush3.bf16.msra.mxu0 %v1935_v11  ;;  %1830 = vmatprep.subr.bf16.mxu1 %v2075_v13 }
  0x19   : > { %381 = vrot.lane.b32.xlu1 %v1929_v9, %s2016_s29 }
  0x1a   : > { %1781 = vmatmul.mubr.msk.bf16.gmra.mrb[4].mxu0 %vm243_vm1, %v1929_v9  ;;  %383 = vrot.lane.b32.xlu0 %v1930_v6, %s2016_s29 }
  0x1c   : > { %1789 = vmatmul.mubr.msk.bf16.gmra.mrb[4].mxu1 %vm243_vm1, %v1933_v10 }
  0x1d   : > { %385 = vrot.lane.b32.xlu1 %v1931_v7, %s2016_s29 }
  0x1e   : > { %387 = vrot.lane.b32.xlu0 %v1932_v8, %s2016_s29  ;;  %v1937_v8 = vld [vmem:[%s2491_s1 + $0x28] sm:$0xff]  }
  0x21   : > { %389 = vrot.lane.b32.xlu1 %v1933_v10, %s2016_s29 }
  0x83   : > { %v376_v1 = vpop.permute.xlu0 %375 }
  0x84   : > { %1794 = vmatprep.mubr.msk.bf16.mxu1 %vm391_vm4, %v376_v1 }
  0x87   : > { %v380_v7 = vpop.permute.xlu1 %379 }
  0x88   : > { %v378_v6 = vpop.permute.xlu0 %377 }
  0x89   : > { %1795 = vmatmul.mubr.msk.bf16.vlgmr.msra.gmra.mrb[8].mxu1 %vm391_vm4, %v378_v6 }
  0x8a   : > { %1798 = vmatprep.mubr.msk.bf16.mxu1 %vm391_vm4, %v380_v7  ;;  %1831 = vmatpush3.bf16.msra.mxu1 %v2075_v13  ;;  %v1938_v13 = vld [vmem:[%s2491_s1 + $0x30] sm:$0xff]  }
  0x8b   : > { %1832 = vmatprep.subr.bf16.mxu1 %v1937_v8  ;;  %v382_v11 = vpop.permute.xlu1 %381  ;;  %1850 = vmatprep.subr.bf16.mxu0 %v1938_v13 }
  0x8c   : > { %v384_v14 = vpop.permute.xlu0 %383 }
  0x8e   : > { %1833 = vmatpush3.bf16.msra.mxu1 %v1937_v8 }
  0x91   : > { %1799 = vmatmul.mubr.msk.bf16.gmra.mrb[12].mxu1 %vm391_vm4, %v382_v11 }
  0x92   : > { %1802 = vmatprep.mubr.msk.bf16.mxu1 %vm391_vm4, %v384_v14 }
  0xe5   : > { %v1778_v16 = vpop.f32.mrb[0].mxu0 }
  0xe6   : > { %v306_v17 = vpop.f32.mrb[1].mxu0  ;;  %v2083_v20 = vadd.f32 %v1778_v16, %v1622_v15  ;;  %v388_v16 = vpop.permute.xlu0 %387 }
  0xe7   : > { %v2081_v18 = vadd.f32 %v1622_v15, %v306_v17  ;;  %v1779_v19 = vpop.f32.mrb[2].mxu0  ;;  %v1786_v24 = vpop.f32.mrb[0].mxu1 }
  0xe8   : > { %v2085_v21 = vadd.f32 %v1779_v19, %v1622_v15  ;;  %v309_v22 = vpop.f32.mrb[3].mxu0  ;;  %v338_v26 = vpop.f32.mrb[1].mxu1  ;;  %v599_v30 = vmax.f32 %v2083_v20, 0.0  ;;  %v2117_v59 = vadd.f32 %v1786_v24, %v1622_v15  ;;  %v1939_v19 = vld [vmem:[%s2491_s1 + $0x38] sm:$0xff]  }
  0xe9   : > { %v2087_v23 = vadd.f32 %v1622_v15, %v309_v22  ;;  %v597_v27 = vmax.f32 %v2081_v18, 0.0  ;;  %v1787_v29 = vpop.f32.mrb[2].mxu1  ;;  %v2093_v34 = vadd.f32 %v1622_v15, %v338_v26  ;;  %v2158_v22 = vld [vmem:[%s2492_s2 + $0x1] ss:$0 sm:$0xff] }
  0xea   : > { %v600_v25 = vmax.f32 %v2085_v21, 0.0  ;;  %v341_v31 = vpop.f32.mrb[3].mxu1  ;;  %v2119_v60 = vadd.f32 %v1787_v29, %v1622_v15  ;;  %v607_v63 = vmax.f32 %v2117_v59, 0.0 }
  0xeb   : > { %v598_v28 = vmax.f32 %v2087_v23, 0.0  ;;  %v2095_v35 = vadd.f32 %v1622_v15, %v341_v31  ;;  %v605_v44 = vmax.f32 %v2093_v34, 0.0 }
  0xec   : > { %v614_v36 = vpack.c.bf16 %v600_v25, %v599_v30  ;;  %v608_v0 = vmax.f32 %v2119_v60, 0.0 }
  0xed   : > { %v613_v32 = vpack.c.bf16 %v598_v28, %v597_v27  ;;  %v1782_v33 = vpop.f32.mrb[4].mxu0  ;;  %v606_v45 = vmax.f32 %v2095_v35, 0.0 }
  0xee   : > { %v322_v37 = vpop.f32.mrb[5].mxu0  ;;  %v2100_v40 = vadd.f32 %v1782_v33, %v1622_v15  ;;  %v618_v3 = vpack.c.bf16 %v608_v0, %v607_v63 }
  0xef   : > { %v2097_v38 = vadd.f32 %v1622_v15, %v322_v37  ;;  %v1783_v39 = vpop.f32.mrb[6].mxu0  ;;  %1814 = vmatprep.mubr.msk.bf16.mxu0 %vm642_vm3, %v613_v32  ;;  %v1790_v46 = vpop.f32.mrb[4].mxu1  ;;  %v617_v55 = vpack.c.bf16 %v606_v45, %v605_v44 }
  0xf0   : > { %v2102_v41 = vadd.f32 %v1783_v39, %v1622_v15  ;;  %v325_v42 = vpop.f32.mrb[7].mxu0  ;;  %1815 = vmatmul.mubr.msk.bf16.vlgmr.msra.gmra.mrb[8].mxu0 %vm642_vm3, %v614_v36  ;;  %v354_v48 = vpop.f32.mrb[5].mxu1  ;;  %v603_v52 = vmax.f32 %v2100_v40, 0.0  ;;  %v2129_v4 = vadd.f32 %v1790_v46, %v1622_v15 }
  0xf1   : > { %v2105_v43 = vadd.f32 %v1622_v15, %v325_v42  ;;  %v601_v49 = vmax.f32 %v2097_v38, 0.0  ;;  %v1791_v51 = vpop.f32.mrb[6].mxu1  ;;  %v2113_v56 = vadd.f32 %v1622_v15, %v354_v48  ;;  %1851 = vmatpush3.bf16.msra.mxu0 %v1938_v13 }
  0xf2   : > { %v604_v47 = vmax.f32 %v2102_v41, 0.0  ;;  %v357_v53 = vpop.f32.mrb[7].mxu1  ;;  %v2131_v5 = vadd.f32 %v1791_v51, %v1622_v15  ;;  %v611_v9 = vmax.f32 %v2129_v4, 0.0  ;;  %1852 = vmatprep.subr.bf16.mxu0 %v1939_v19 }
  0xf3   : > { %v602_v50 = vmax.f32 %v2105_v43, 0.0  ;;  %v2115_v57 = vadd.f32 %v1622_v15, %v357_v53  ;;  %v609_v61 = vmax.f32 %v2113_v56, 0.0  ;;  %v386_v15 = vpop.permute.xlu1 %385 }
  0xf4   : > { %v616_v58 = vpack.c.bf16 %v604_v47, %v603_v52  ;;  %v612_v10 = vmax.f32 %v2131_v5, 0.0  ;;  %1803 = vmatmul.mubr.msk.bf16.gmra.mrb[16].mxu1 %vm391_vm4, %v386_v15 }
  0xf5   : > { %v615_v54 = vpack.c.bf16 %v602_v50, %v601_v49  ;;  %v610_v62 = vmax.f32 %v2115_v57, 0.0  ;;  %1806 = vmatprep.mubr.msk.bf16.mxu1 %vm391_vm4, %v388_v16  ;;  %1853 = vmatpush3.bf16.msra.mxu0 %v1939_v19 }
  0xf6   : > { %v620_v12 = vpack.c.bf16 %v612_v10, %v611_v9 }
  0xf7   : > { %1818 = vmatprep.mubr.msk.bf16.mxu0 %vm642_vm3, %v615_v54  ;;  %v619_v2 = vpack.c.bf16 %v610_v62, %v609_v61  ;;  %v390_v17 = vpop.permute.xlu1 %389  ;;  %v2173_v61 = vld [vmem:[%s2492_s2 + $0x5] ss:$0 sm:$0xff] }
  0xf8   : > { %1819 = vmatmul.mubr.msk.bf16.gmra.mrb[12].mxu0 %vm642_vm3, %v616_v58 }
  0xf9   : > { %1822 = vmatprep.mubr.msk.bf16.mxu0 %vm642_vm3, %v617_v55 }
  0xfc   : > { %1807 = vmatmul.mubr.msk.bf16.gmra.mrb[20].mxu1 %vm391_vm4, %v390_v17 }
 0x100   : > { %1823 = vmatmul.mubr.msk.bf16.gmra.mrb[16].mxu0 %vm642_vm3, %v618_v3 }
 0x101   : > { %1826 = vmatprep.mubr.msk.bf16.mxu0 %vm642_vm3, %v619_v2 }
 0x108   : > { %1827 = vmatmul.mubr.msk.bf16.gmra.mrb[20].mxu0 %vm642_vm3, %v620_v12 }
 0x15c   : > { %v1796_v0 = vpop.f32.mrb[8].mxu1 }
 0x15d   : > { %v463_v3 = vadd.f32 %v1796_v0, %v2173_v61  ;;  %v454_v6 = vpop.f32.mrb[9].mxu1 }
 0x15e   : > { %v455_v9 = vadd.f32 %v2173_v61, %v454_v6  ;;  %v1797_v10 = vpop.f32.mrb[10].mxu1 }
 0x15f   : > { %v519_v14 = vsub.f32 0.0, %v463_v3  ;;  %v466_v15 = vadd.f32 %v1797_v10, %v2173_v61  ;;  %v457_v16 = vpop.f32.mrb[11].mxu1 }
 0x160   : > { %v517_v13 = vsub.f32 0.0, %v455_v9  ;;  %v458_v19 = vadd.f32 %v2173_v61, %v457_v16 }
 0x1c3   : > { %v1816_v24 = vpop.f32.mrb[8].mxu0 }
 0x1c4   : > { %v710_v25 = vadd.f32 %v1816_v24, %v2158_v22  ;;  %v701_v26 = vpop.f32.mrb[9].mxu0 }
 0x1c5   : > { %v702_v27 = vadd.f32 %v2158_v22, %v701_v26  ;;  %v1817_v28 = vpop.f32.mrb[10].mxu0  ;;  %v537_v26 = vmul.f32 1.442695, %v519_v14 }
 0x1c6   : > { %v713_v29 = vadd.f32 %v1817_v28, %v2158_v22  ;;  %v704_v30 = vpop.f32.mrb[11].mxu0  ;;  %v766_v32 = vmax.f32 %v710_v25, 0.0 }
 0x1c7   : > { %v705_v31 = vadd.f32 %v2158_v22, %v704_v30  ;;  %v764_v36 = vmax.f32 %v702_v27, 0.0  ;;  %v520_v27 = vsub.f32 0.0, %v466_v15  ;;  %v533_v30 = vmul.f32 1.442695, %v517_v13 }
 0x1c8   : > { %v767_v33 = vmax.f32 %v713_v29, 0.0  ;;  %1944 = vpow2.f32 %v537_v26 }
 0x1c9   : > { %v765_v37 = vmax.f32 %v705_v31, 0.0  ;;  %v518_v31 = vsub.f32 0.0, %v458_v19  ;;  %1946 = vpow2.f32 %v533_v30 }
 0x1ca   : > { %v781_v39 = vpack.c.bf16 %v767_v33, %v766_v32  ;;  %v539_v33 = vmul.f32 1.442695, %v520_v27 }
 0x1cb   : > { %v780_v42 = vpack.c.bf16 %v765_v37, %v764_v36  ;;  %v1820_v44 = vpop.f32.mrb[12].mxu0 }
 0x1cc   : > { %v726_v45 = vadd.f32 %v1820_v44, %v2158_v22  ;;  %v717_v46 = vpop.f32.mrb[13].mxu0  ;;  %1948 = vpow2.f32 %v539_v33 }
 0x1cd   : > { %v718_v47 = vadd.f32 %v2158_v22, %v717_v46  ;;  %v1821_v48 = vpop.f32.mrb[14].mxu0  ;;  %1834 = vmatprep.mubr.msk.bf16.mxu1 %vm642_vm3, %v780_v42  ;;  %v1800_v42 = vpop.f32.mrb[12].mxu1 }
 0x1ce   : > { %v729_v49 = vadd.f32 %v1821_v48, %v2158_v22  ;;  %v720_v50 = vpop.f32.mrb[15].mxu0  ;;  %1835 = vmatmul.mubr.msk.bf16.vlgmr.msra.gmra.mrb[24].mxu1 %vm642_vm3, %v781_v39  ;;  %v770_v52 = vmax.f32 %v726_v45, 0.0  ;;  %v535_v39 = vmul.f32 1.442695, %v518_v31  ;;  %v479_v46 = vadd.f32 %v1800_v42, %v2173_v61 }
 0x1cf   : > { %v721_v51 = vadd.f32 %v2158_v22, %v720_v50  ;;  %v768_v54 = vmax.f32 %v718_v47, 0.0  ;;  %v470_v47 = vpop.f32.mrb[13].mxu1 }
 0x1d0   : > { %v771_v53 = vmax.f32 %v729_v49, 0.0  ;;  %1950 = vpow2.f32 %v535_v39  ;;  %v471_v50 = vadd.f32 %v2173_v61, %v470_v47 }
 0x1d1   : > { %v769_v55 = vmax.f32 %v721_v51, 0.0  ;;  %v1801_v51 = vpop.f32.mrb[14].mxu1 }
 0x1d2   : > { %v783_v58 = vpack.c.bf16 %v771_v53, %v770_v52 }
 0x1d3   : > { %v782_v62 = vpack.c.bf16 %v769_v55, %v768_v54  ;;  %v1824_v63 = vpop.f32.mrb[16].mxu0  ;;  %v523_v54 = vsub.f32 0.0, %v479_v46  ;;  %v482_v55 = vadd.f32 %v1801_v51, %v2173_v61 }
 0x1d4   : > { %v742_v1 = vadd.f32 %v1824_v63, %v2158_v22  ;;  %v733_v2 = vpop.f32.mrb[17].mxu0  ;;  %v521_v63 = vsub.f32 0.0, %v471_v50 }
 0x1d5   : > { %v734_v7 = vadd.f32 %v2158_v22, %v733_v2  ;;  %v1825_v8 = vpop.f32.mrb[18].mxu0  ;;  %1838 = vmatprep.mubr.msk.bf16.mxu1 %vm642_vm3, %v782_v62  ;;  %v545_v3 = vmul.f32 1.442695, %v523_v54  ;;  %v524_v6 = vsub.f32 0.0, %v482_v55 }
 0x1d6   : > { %v745_v11 = vadd.f32 %v1825_v8, %v2158_v22  ;;  %v736_v12 = vpop.f32.mrb[19].mxu0  ;;  %1839 = vmatmul.mubr.msk.bf16.gmra.mrb[28].mxu1 %vm642_vm3, %v783_v58  ;;  %v774_v24 = vmax.f32 %v742_v1, 0.0  ;;  %v473_v58 = vpop.f32.mrb[15].mxu1  ;;  %v541_v9 = vmul.f32 1.442695, %v521_v63 }
 0x1d7   : > { %v737_v17 = vadd.f32 %v2158_v22, %v736_v12  ;;  %v772_v28 = vmax.f32 %v734_v7, 0.0  ;;  %v474_v0 = vadd.f32 %v2173_v61, %v473_v58  ;;  %1952 = vpow2.f32 %v545_v3  ;;  %v1804_v16 = vpop.f32.mrb[16].mxu1 }
 0x1d8   : > { %v775_v25 = vmax.f32 %v745_v11, 0.0  ;;  %v547_v12 = vmul.f32 1.442695, %v524_v6  ;;  %1954 = vpow2.f32 %v541_v9  ;;  %v486_v13 = vpop.f32.mrb[17].mxu1 }
 0x1d9   : > { %v773_v29 = vmax.f32 %v737_v17, 0.0  ;;  %v522_v10 = vsub.f32 0.0, %v474_v0  ;;  %v1945_v17 = vpop.eup %1944  ;;  %v1805_v26 = vpop.f32.mrb[18].mxu1 }
 0x1da   : > { %v785_v32 = vpack.c.bf16 %v775_v25, %v774_v24  ;;  %1956 = vpow2.f32 %v547_v12  ;;  %v1947_v19 = vpop.eup %1946  ;;  %v567_v24 = vadd.f32 1.0, %v1945_v17  ;;  %v487_v25 = vadd.f32 %v2173_v61, %v486_v13  ;;  %v489_v31 = vpop.f32.mrb[19].mxu1 }
 0x1db   : > { %v784_v36 = vpack.c.bf16 %v773_v29, %v772_v28  ;;  %v1828_v37 = vpop.f32.mrb[20].mxu0  ;;  %v543_v15 = vmul.f32 1.442695, %v522_v10  ;;  %v1949_v27 = vpop.eup %1948  ;;  %v565_v28 = vadd.f32 1.0, %v1947_v19  ;;  %v498_v30 = vadd.f32 %v1805_v26, %v2173_v61 }
 0x1dc   : > { %v758_v44 = vadd.f32 %v1828_v37, %v2158_v22  ;;  %v749_v45 = vpop.f32.mrb[21].mxu0  ;;  %v568_v33 = vadd.f32 1.0, %v1949_v27  ;;  %v490_v37 = vadd.f32 %v2173_v61, %v489_v31 }
 0x1dd   : > { %v750_v48 = vadd.f32 %v2158_v22, %v749_v45  ;;  %v1829_v49 = vpop.f32.mrb[22].mxu0  ;;  %1842 = vmatprep.mubr.msk.bf16.mxu1 %vm642_vm3, %v784_v36  ;;  %1958 = vpow2.f32 %v543_v15  ;;  %v525_v36 = vsub.f32 0.0, %v487_v25 }
 0x1de   : > { %v761_v52 = vadd.f32 %v1829_v49, %v2158_v22  ;;  %v752_v53 = vpop.f32.mrb[23].mxu0  ;;  %1843 = vmatmul.mubr.msk.bf16.gmra.mrb[32].mxu1 %vm642_vm3, %v785_v32  ;;  %v778_v1 = vmax.f32 %v758_v44, 0.0  ;;  %v1951_v32 = vpop.eup %1950  ;;  %1960 = vrcp.f32 %v567_v24  ;;  %v528_v44 = vsub.f32 0.0, %v498_v30 }
 0x1df   : > { %v753_v62 = vadd.f32 %v2158_v22, %v752_v53  ;;  %v776_v7 = vmax.f32 %v750_v48, 0.0  ;;  %v495_v22 = vadd.f32 %v1804_v16, %v2173_v61  ;;  %1962 = vrcp.f32 %v565_v28  ;;  %v1808_v49 = vpop.f32.mrb[20].mxu1 }
 0x1e0   : > { %v779_v2 = vmax.f32 %v761_v52, 0.0  ;;  %v566_v39 = vadd.f32 1.0, %v1951_v32  ;;  %1964 = vrcp.f32 %v568_v33  ;;  %v549_v45 = vmul.f32 1.442695, %v525_v36  ;;  %v502_v52 = vpop.f32.mrb[21].mxu1 }
 0x1e1   : > { %v777_v8 = vmax.f32 %v753_v62, 0.0  ;;  %v527_v29 = vsub.f32 0.0, %v495_v22  ;;  %v526_v46 = vsub.f32 0.0, %v490_v37  ;;  %v555_v47 = vmul.f32 1.442695, %v528_v44  ;;  %v1953_v50 = vpop.eup %1952  ;;  %v1809_v58 = vpop.f32.mrb[22].mxu1 }
 0x1e2   : > { %v787_v11 = vpack.c.bf16 %v779_v2, %v778_v1  ;;  %1966 = vrcp.f32 %v566_v39  ;;  %v511_v51 = vadd.f32 %v1808_v49, %v2173_v61  ;;  %v1955_v53 = vpop.eup %1954  ;;  %v571_v54 = vadd.f32 1.0, %v1953_v50  ;;  %v505_v2 = vpop.f32.mrb[23].mxu1 }
 0x1e3   : > { %v786_v14 = vpack.c.bf16 %v777_v8, %v776_v7  ;;  %v553_v42 = vmul.f32 1.442695, %v527_v29  ;;  %v551_v48 = vmul.f32 1.442695, %v526_v46  ;;  %v503_v55 = vadd.f32 %v2173_v61, %v502_v52 }
 0x1e4   : > { %v1957_v62 = vpop.eup %1956  ;;  %v569_v63 = vadd.f32 1.0, %v1955_v53  ;;  %v531_v0 = vsub.f32 0.0, %v511_v51  ;;  %v514_v1 = vadd.f32 %v1809_v58, %v2173_v61  ;;  %v506_v8 = vadd.f32 %v2173_v61, %v505_v2 }
 0x1e5   : > { %1846 = vmatprep.mubr.msk.bf16.mxu1 %vm642_vm3, %v786_v14  ;;  %1968 = vpow2.f32 %v553_v42  ;;  %v572_v6 = vadd.f32 1.0, %v1957_v62  ;;  %v529_v7 = vsub.f32 0.0, %v503_v55  ;;  %v1940_v62 = vld [vmem:[%s2491_s1 + $0x40] sm:$0xff]  }
 0x1e6   : > { %1847 = vmatmul.mubr.msk.bf16.gmra.mrb[36].mxu1 %vm642_vm3, %v787_v11  ;;  %1970 = vpow2.f32 %v549_v45  ;;  %v561_v10 = vmul.f32 1.442695, %v531_v0  ;;  %v532_v11 = vsub.f32 0.0, %v514_v1  ;;  %v530_v15 = vsub.f32 0.0, %v506_v8  ;;  %1870 = vmatprep.subr.bf16.mxu1 %v1940_v62  ;;  %v2278_v0 = vld [vmem:[%s2492_s2 + $0x3] ss:$0 sm:$0xff] }
 0x1e7   : > { %1972 = vpow2.f32 %v555_v47  ;;  %v1959_v3 = vpop.eup %1958  ;;  %v557_v14 = vmul.f32 1.442695, %v529_v7  ;;  %1871 = vmatpush3.bf16.msra.mxu1 %v1940_v62 }
 0x1e8   : > { %1974 = vpow2.f32 %v551_v48  ;;  %v570_v9 = vadd.f32 1.0, %v1959_v3  ;;  %v2205_v12 = vpop.eup %1960  ;;  %v563_v17 = vmul.f32 1.442695, %v532_v11  ;;  %v559_v13 = vmul.f32 1.442695, %v530_v15 }
 0x1e9   : > { %1976 = vrcp.f32 %v571_v54  ;;  %v2207_v16 = vpop.eup %1962 }
 0x1ea   : > { %1978 = vrcp.f32 %v569_v63  ;;  %v2209_v22 = vpop.eup %1964  ;;  %1310 = vrot.lane.b32.xlu0 %v2207_v16, %s2017_s17  ;;  %v1941_v63 = vld [vmem:[%s2491_s1 + $0x48] sm:$0xff]  }
 0x1eb   : > { %1980 = vrcp.f32 %v572_v6  ;;  %1872 = vmatprep.subr.bf16.mxu1 %v1941_v63 }
 0x1ec   : > { %1982 = vrcp.f32 %v570_v9  ;;  %v2213_v61 = vpop.eup %1966  ;;  %1873 = vmatpush3.bf16.msra.mxu1 %v1941_v63 }
 0x1ed   : > { %1984 = vpow2.f32 %v561_v10  ;;  %1312 = vrot.lane.b32.xlu1 %v2213_v61, %s2017_s17 }
 0x1ee   : > { %1986 = vpow2.f32 %v557_v14  ;;  %1314 = vrot.lane.b32.xlu0 %v2205_v12, %s2017_s17 }
 0x1ef   : > { %v1969_v19 = vpop.eup %1968  ;;  %1988 = vpow2.f32 %v563_v17 }
 0x1f0   : > { %v1971_v24 = vpop.eup %1970  ;;  %v575_v25 = vadd.f32 1.0, %v1969_v19  ;;  %1990 = vpow2.f32 %v559_v13 }
 0x1f1   : > { %v1973_v26 = vpop.eup %1972  ;;  %v573_v27 = vadd.f32 1.0, %v1971_v24  ;;  %1316 = vrot.lane.b32.xlu1 %v2209_v22, %s2017_s17 }
 0x1f2   : > { %v1975_v28 = vpop.eup %1974  ;;  %v576_v30 = vadd.f32 1.0, %v1973_v26 }
 0x1f3   : > { %v2219_v29 = vpop.eup %1976  ;;  %1992 = vrcp.f32 %v573_v27  ;;  %v574_v31 = vadd.f32 1.0, %v1975_v28 }
 0x1f4   : > { %v2223_v32 = vpop.eup %1978  ;;  %1994 = vrcp.f32 %v575_v25 }
 0x1f5   : > { %v2225_v33 = vpop.eup %1980  ;;  %1996 = vrcp.f32 %v574_v31  ;;  %1318 = vrot.lane.b32.xlu0 %v2223_v32, %s2017_s17 }
 0x1f6   : > { %v2229_v36 = vpop.eup %1982  ;;  %1998 = vrcp.f32 %v576_v30 }
 0x1f7   : > { %v1985_v37 = vpop.eup %1984  ;;  %1320 = vrot.lane.b32.xlu1 %v2229_v36, %s2017_s17 }
 0x1f8   : > { %v1987_v39 = vpop.eup %1986  ;;  %v579_v42 = vadd.f32 1.0, %v1985_v37 }
 0x1f9   : > { %v1989_v44 = vpop.eup %1988  ;;  %v577_v45 = vadd.f32 1.0, %v1987_v39  ;;  %1322 = vrot.lane.b32.xlu0 %v2219_v29, %s2017_s17 }
 0x1fa   : > { %v1991_v46 = vpop.eup %1990  ;;  %v580_v47 = vadd.f32 1.0, %v1989_v44 }
 0x1fb   : > { %2000 = vrcp.f32 %v577_v45  ;;  %v578_v48 = vadd.f32 1.0, %v1991_v46  ;;  %1324 = vrot.lane.b32.xlu1 %v2225_v33, %s2017_s17 }
 0x1fc   : > { %2002 = vrcp.f32 %v579_v42 }
 0x1fd   : > { %v2237_v49 = vpop.eup %1992  ;;  %2004 = vrcp.f32 %v578_v48 }
 0x1fe   : > { %v2239_v50 = vpop.eup %1994  ;;  %1326 = vrot.lane.b32.xlu0 %v2237_v49, %s2017_s17  ;;  %2006 = vrcp.f32 %v580_v47 }
 0x1ff   : > { %v2243_v51 = vpop.eup %1996 }
 0x200   : > { %1328 = vrot.lane.b32.xlu1 %v2243_v51, %s2017_s17  ;;  %v2247_v52 = vpop.eup %1998 }
 0x202   : > { %1330 = vrot.lane.b32.xlu0 %v2239_v50, %s2017_s17 }
 0x204   : > { %1332 = vrot.lane.b32.xlu1 %v2247_v52, %s2017_s17 }
 0x205   : > { %v2253_v53 = vpop.eup %2000 }
 0x206   : > { %v2255_v54 = vpop.eup %2002  ;;  %1334 = vrot.lane.b32.xlu0 %v2253_v53, %s2017_s17 }
 0x207   : > { %v2259_v55 = vpop.eup %2004 }
 0x208   : > { %1336 = vrot.lane.b32.xlu1 %v2259_v55, %s2017_s17  ;;  %v2263_v58 = vpop.eup %2006 }
 0x20a   : > { %1338 = vrot.lane.b32.xlu0 %v2255_v54, %s2017_s17 }
 0x20c   : > { %1340 = vrot.lane.b32.xlu1 %v2263_v58, %s2017_s17 }
 0x2a1   : > { %v1836_v1 = vpop.f32.mrb[24].mxu1 }
 0x2a2   : > { %v876_v2 = vadd.f32 %v1836_v1, %v2278_v0  ;;  %v867_v3 = vpop.f32.mrb[25].mxu1 }
 0x2a3   : > { %v868_v6 = vadd.f32 %v2278_v0, %v867_v3  ;;  %v1837_v7 = vpop.f32.mrb[26].mxu1 }
 0x2a4   : > { %v932_v8 = vmul.f32 %v2205_v12, %v876_v2  ;;  %v879_v9 = vadd.f32 %v1837_v7, %v2278_v0  ;;  %v870_v10 = vpop.f32.mrb[27].mxu1 }
 0x2a5   : > { %v930_v11 = vmul.f32 %v2207_v16, %v868_v6  ;;  %v871_v14 = vadd.f32 %v2278_v0, %v870_v10 }
 0x2a6   : > { %v933_v15 = vmul.f32 %v2209_v22, %v879_v9  ;;  %v2292_v19 = vadd.f32 %v932_v8, %v2083_v20 }
 0x2a7   : > { %v2288_v17 = vadd.f32 %v930_v11, %v2081_v18  ;;  %v931_v13 = vmul.f32 %v2213_v61, %v871_v14 }
 0x2a8   : > { %v2295_v24 = vadd.f32 %v933_v15, %v2085_v21  ;;  %v964_v28 = vmax.f32 %v2292_v19, 0.0 }
 0x2a9   : > { %v2298_v12 = vadd.f32 %v931_v13, %v2087_v23  ;;  %v1840_v25 = vpop.f32.mrb[28].mxu1  ;;  %v962_v18 = vmax.f32 %v2288_v17, 0.0 }
 0x2aa   : > { %v965_v16 = vmax.f32 %v2295_v24, 0.0  ;;  %v892_v26 = vadd.f32 %v1840_v25, %v2278_v0  ;;  %v883_v22 = vpop.f32.mrb[29].mxu1 }
 0x2ab   : > { %v963_v27 = vmax.f32 %v2298_v12, 0.0  ;;  %v884_v61 = vadd.f32 %v2278_v0, %v883_v22  ;;  %v1841_v20 = vpop.f32.mrb[30].mxu1 }
 0x2ac   : > { %v936_v21 = vmul.f32 %v2219_v29, %v892_v26  ;;  %v895_v23 = vadd.f32 %v1841_v20, %v2278_v0  ;;  %v886_v30 = vpop.f32.mrb[31].mxu1  ;;  %v979_v42 = vpack.c.bf16 %v965_v16, %v964_v28 }
 0x2ad   : > { %v934_v31 = vmul.f32 %v2223_v32, %v884_v61  ;;  %v887_v37 = vadd.f32 %v2278_v0, %v886_v30  ;;  %v978_v39 = vpack.c.bf16 %v963_v27, %v962_v18 }
 0x2ae   : > { %v937_v44 = vmul.f32 %v2225_v33, %v895_v23  ;;  %v2317_v29 = vadd.f32 %v936_v21, %v2100_v40 }
 0x2af   : > { %v2312_v45 = vadd.f32 %v934_v31, %v2097_v38  ;;  %v935_v46 = vmul.f32 %v2229_v36, %v887_v37  ;;  %1854 = vmatprep.mubr.msk.bf16.mxu0 %vm642_vm3, %v978_v39 }
 0x2b0   : > { %v2320_v47 = vadd.f32 %v937_v44, %v2102_v41  ;;  %1855 = vmatmul.mubr.msk.bf16.vlgmr.msra.gmra.mrb[24].mxu0 %vm642_vm3, %v979_v42  ;;  %v968_v41 = vmax.f32 %v2317_v29, 0.0 }
 0x2b1   : > { %v2324_v32 = vadd.f32 %v935_v46, %v2105_v43  ;;  %v1844_v48 = vpop.f32.mrb[32].mxu1  ;;  %v966_v36 = vmax.f32 %v2312_v45, 0.0 }
 0x2b2   : > { %v969_v33 = vmax.f32 %v2320_v47, 0.0  ;;  %v908_v38 = vadd.f32 %v1844_v48, %v2278_v0  ;;  %v899_v62 = vpop.f32.mrb[33].mxu1 }
 0x2b3   : > { %v967_v63 = vmax.f32 %v2324_v32, 0.0  ;;  %v900_v40 = vadd.f32 %v2278_v0, %v899_v62  ;;  %v1845_v1 = vpop.f32.mrb[34].mxu1 }
 0x2b4   : > { %v940_v2 = vmul.f32 %v2239_v50, %v908_v38  ;;  %v911_v43 = vadd.f32 %v1845_v1, %v2278_v0  ;;  %v902_v3 = vpop.f32.mrb[35].mxu1  ;;  %v981_v10 = vpack.c.bf16 %v969_v33, %v968_v41 }
 0x2b5   : > { %v938_v6 = vmul.f32 %v2237_v49, %v900_v40  ;;  %v903_v7 = vadd.f32 %v2278_v0, %v902_v3  ;;  %v980_v8 = vpack.c.bf16 %v967_v63, %v966_v36 }
 0x2b6   : > { %v941_v9 = vmul.f32 %v2247_v52, %v911_v43  ;;  %v2343_v50 = vadd.f32 %v940_v2, %v2117_v59 }
 0x2b7   : > { %v2338_v11 = vadd.f32 %v938_v6, %v2093_v34  ;;  %v939_v14 = vmul.f32 %v2243_v51, %v903_v7  ;;  %1858 = vmatprep.mubr.msk.bf16.mxu0 %vm642_vm3, %v980_v8 }
 0x2b8   : > { %v2346_v15 = vadd.f32 %v941_v9, %v2119_v60  ;;  %1859 = vmatmul.mubr.msk.bf16.gmra.mrb[28].mxu0 %vm642_vm3, %v981_v10  ;;  %v972_v60 = vmax.f32 %v2343_v50, 0.0 }
 0x2b9   : > { %v2350_v49 = vadd.f32 %v939_v14, %v2095_v35  ;;  %v1848_v52 = vpop.f32.mrb[36].mxu1  ;;  %v970_v51 = vmax.f32 %v2338_v11, 0.0 }
 0x2ba   : > { %v973_v13 = vmax.f32 %v2346_v15, 0.0  ;;  %v924_v34 = vadd.f32 %v1848_v52, %v2278_v0  ;;  %v915_v25 = vpop.f32.mrb[37].mxu1 }
 0x2bb   : > { %v971_v16 = vmax.f32 %v2350_v49, 0.0  ;;  %v916_v59 = vadd.f32 %v2278_v0, %v915_v25  ;;  %v1849_v26 = vpop.f32.mrb[38].mxu1 }
 0x2bc   : > { %v944_v22 = vmul.f32 %v2255_v54, %v924_v34  ;;  %v927_v35 = vadd.f32 %v1849_v26, %v2278_v0  ;;  %v918_v18 = vpop.f32.mrb[39].mxu1  ;;  %v983_v21 = vpack.c.bf16 %v973_v13, %v972_v60 }
 0x2bd   : > { %v942_v27 = vmul.f32 %v2253_v53, %v916_v59  ;;  %v919_v61 = vadd.f32 %v2278_v0, %v918_v18  ;;  %v982_v20 = vpack.c.bf16 %v971_v16, %v970_v51 }
 0x2be   : > { %v945_v28 = vmul.f32 %v2263_v58, %v927_v35  ;;  %v2369_v54 = vadd.f32 %v944_v22, %v2129_v4  ;;  %v1942_v4 = vld [vmem:[%s2491_s1 + $0x50] sm:$0xff]  }
 0x2bf   : > { %v2364_v23 = vadd.f32 %v942_v27, %v2113_v56  ;;  %v943_v30 = vmul.f32 %v2259_v55, %v919_v61  ;;  %1862 = vmatprep.mubr.msk.bf16.mxu0 %vm642_vm3, %v982_v20  ;;  %1890 = vmatprep.subr.bf16.mxu0 %v1942_v4 }
 0x2c0   : > { %v2372_v31 = vadd.f32 %v945_v28, %v2131_v5  ;;  %1863 = vmatmul.mubr.msk.bf16.gmra.mrb[32].mxu0 %vm642_vm3, %v983_v21  ;;  %v976_v55 = vmax.f32 %v2369_v54, 0.0  ;;  %v1671_v5 = vld [vmem:[%s2492_s2 + $0x2] ss:$0 sm:$0xff] }
 0x2c1   : > { %v2376_v53 = vadd.f32 %v943_v30, %v2115_v57  ;;  %v974_v56 = vmax.f32 %v2364_v23, 0.0  ;;  %v1943_v57 = vld [vmem:[%s2491_s1 + $0x58] sm:$0xff]   ;;  %1891 = vmatpush3.bf16.msra.mxu0 %v1942_v4 }
 0x2c2   : > { %v977_v58 = vmax.f32 %v2372_v31, 0.0  ;;  %1892 = vmatprep.subr.bf16.mxu0 %v1943_v57 }
 0x2c3   : > { %v975_v0 = vmax.f32 %v2376_v53, 0.0 }
 0x2c4   : > { %v985_v39 = vpack.c.bf16 %v977_v58, %v976_v55 }
 0x2c5   : > { %v984_v37 = vpack.c.bf16 %v975_v0, %v974_v56  ;;  %1893 = vmatpush3.bf16.msra.mxu0 %v1943_v57 }
 0x2c7   : > { %1866 = vmatprep.mubr.msk.bf16.mxu0 %vm642_vm3, %v984_v37 }
 0x2c8   : > { %1867 = vmatmul.mubr.msk.bf16.gmra.mrb[36].mxu0 %vm642_vm3, %v985_v39 }
 0x383   : > { %v1856_v42 = vpop.f32.mrb[24].mxu0 }
 0x384   : > { %v1074_v44 = vadd.f32 %v1856_v42, %v1671_v5  ;;  %v1065_v46 = vpop.f32.mrb[25].mxu0 }
 0x385   : > { %v1066_v48 = vadd.f32 %v1671_v5, %v1065_v46  ;;  %v1857_v33 = vpop.f32.mrb[26].mxu0 }
 0x386   : > { %v1077_v38 = vadd.f32 %v1857_v33, %v1671_v5  ;;  %v1068_v62 = vpop.f32.mrb[27].mxu0  ;;  %v1130_v63 = vmax.f32 %v1074_v44, 0.0 }
 0x387   : > { %v1069_v36 = vadd.f32 %v1671_v5, %v1068_v62  ;;  %v1128_v1 = vmax.f32 %v1066_v48, 0.0 }
 0x388   : > { %v1131_v40 = vmax.f32 %v1077_v38, 0.0 }
 0x389   : > { %v1129_v41 = vmax.f32 %v1069_v36, 0.0 }
 0x38a   : > { %v1145_v2 = vpack.c.bf16 %v1131_v40, %v1130_v63  ;;  %v1311_v40 = vpop.permute.xlu0 %1310 }
 0x38b   : > { %v1144_v43 = vpack.c.bf16 %v1129_v41, %v1128_v1  ;;  %v1860_v3 = vpop.f32.mrb[28].mxu0  ;;  %v1313_v1 = vpop.permute.xlu1 %1312 }
 0x38c   : > { %v1090_v6 = vadd.f32 %v1860_v3, %v1671_v5  ;;  %v1081_v7 = vpop.f32.mrb[29].mxu0 }
 0x38d   : > { %v1082_v8 = vadd.f32 %v1671_v5, %v1081_v7  ;;  %v1861_v9 = vpop.f32.mrb[30].mxu0  ;;  %1874 = vmatprep.mubr.msk.bf16.mxu1 %vm642_vm3, %v1144_v43 }
 0x38e   : > { %v1093_v10 = vadd.f32 %v1861_v9, %v1671_v5  ;;  %v1084_v14 = vpop.f32.mrb[31].mxu0  ;;  %1875 = vmatmul.mubr.msk.bf16.vlgmr.msra.gmra.mrb[40].mxu1 %vm642_vm3, %v1145_v2  ;;  %v1134_v13 = vmax.f32 %v1090_v6, 0.0  ;;  %v1315_v41 = vpop.permute.xlu0 %1314 }
 0x38f   : > { %v1085_v52 = vadd.f32 %v1671_v5, %v1084_v14  ;;  %v1132_v25 = vmax.f32 %v1082_v8, 0.0  ;;  %v1317_v2 = vpop.permute.xlu1 %1316 }
 0x390   : > { %v1135_v34 = vmax.f32 %v1093_v10, 0.0 }
 0x391   : > { %v1133_v51 = vmax.f32 %v1085_v52, 0.0 }
 0x392   : > { %v1147_v16 = vpack.c.bf16 %v1135_v34, %v1134_v13  ;;  %v1319_v43 = vpop.permute.xlu0 %1318 }
 0x393   : > { %v1146_v59 = vpack.c.bf16 %v1133_v51, %v1132_v25  ;;  %v1864_v26 = vpop.f32.mrb[32].mxu0  ;;  %v1321_v3 = vpop.permute.xlu1 %1320 }
 0x394   : > { %v1106_v60 = vadd.f32 %v1864_v26, %v1671_v5  ;;  %v1097_v22 = vpop.f32.mrb[33].mxu0 }
 0x395   : > { %v1098_v35 = vadd.f32 %v1671_v5, %v1097_v22  ;;  %v1865_v18 = vpop.f32.mrb[34].mxu0  ;;  %1878 = vmatprep.mubr.msk.bf16.mxu1 %vm642_vm3, %v1146_v59 }
 0x396   : > { %v1109_v27 = vadd.f32 %v1865_v18, %v1671_v5  ;;  %v1100_v61 = vpop.f32.mrb[35].mxu0  ;;  %1879 = vmatmul.mubr.msk.bf16.gmra.mrb[44].mxu1 %vm642_vm3, %v1147_v16  ;;  %v1138_v28 = vmax.f32 %v1106_v60, 0.0  ;;  %v1323_v9 = vpop.permute.xlu0 %1322 }
 0x397   : > { %v1101_v20 = vadd.f32 %v1671_v5, %v1100_v61  ;;  %v1136_v30 = vmax.f32 %v1098_v35, 0.0  ;;  %v1325_v25 = vpop.permute.xlu1 %1324 }
 0x398   : > { %v1139_v21 = vmax.f32 %v1109_v27, 0.0 }
 0x399   : > { %v1137_v58 = vmax.f32 %v1101_v20, 0.0 }
 0x39a   : > { %v1149_v56 = vpack.c.bf16 %v1139_v21, %v1138_v28  ;;  %v1327_v35 = vpop.permute.xlu0 %1326 }
 0x39b   : > { %v1148_v0 = vpack.c.bf16 %v1137_v58, %v1136_v30  ;;  %v1868_v55 = vpop.f32.mrb[36].mxu0  ;;  %v1329_v30 = vpop.permute.xlu1 %1328 }
 0x39c   : > { %v1122_v37 = vadd.f32 %v1868_v55, %v1671_v5  ;;  %v1113_v39 = vpop.f32.mrb[37].mxu0 }
 0x39d   : > { %v1114_v4 = vadd.f32 %v1671_v5, %v1113_v39  ;;  %v1869_v57 = vpop.f32.mrb[38].mxu0  ;;  %1882 = vmatprep.mubr.msk.bf16.mxu1 %vm642_vm3, %v1148_v0 }
 0x39e   : > { %v1125_v42 = vadd.f32 %v1869_v57, %v1671_v5  ;;  %v1116_v44 = vpop.f32.mrb[39].mxu0  ;;  %1883 = vmatmul.mubr.msk.bf16.gmra.mrb[48].mxu1 %vm642_vm3, %v1149_v56  ;;  %v1142_v48 = vmax.f32 %v1122_v37, 0.0 }
 0x39f   : > { %v1117_v46 = vadd.f32 %v1671_v5, %v1116_v44  ;;  %v1140_v38 = vmax.f32 %v1114_v4, 0.0  ;;  %v2404_v5 = vld [vmem:[%s2492_s2 + $0x4] ss:$0 sm:$0xff]  ;;  %v1333_v44 = vpop.permute.xlu1 %1332 }
 0x3a0   : > { %v1143_v33 = vmax.f32 %v1125_v42, 0.0 }
 0x3a1   : > { %v1141_v62 = vmax.f32 %v1117_v46, 0.0 }
 0x3a2   : > { %v1151_v36 = vpack.c.bf16 %v1143_v33, %v1142_v48 }
 0x3a3   : > { %v1150_v63 = vpack.c.bf16 %v1141_v62, %v1140_v38 }
 0x3a5   : > { %1886 = vmatprep.mubr.msk.bf16.mxu1 %vm642_vm3, %v1150_v63 }
 0x3a6   : > { %1887 = vmatmul.mubr.msk.bf16.gmra.mrb[52].mxu1 %vm642_vm3, %v1151_v36 }
 0x461   : > { %v1876_v6 = vpop.f32.mrb[40].mxu1 }
 0x462   : > { %v1240_v7 = vadd.f32 %v1876_v6, %v2404_v5  ;;  %v1231_v8 = vpop.f32.mrb[41].mxu1 }
 0x463   : > { %v1232_v10 = vadd.f32 %v2404_v5, %v1231_v8  ;;  %v1877_v14 = vpop.f32.mrb[42].mxu1 }
 0x464   : > { %v1360_v52 = vmul.f32 %v1315_v41, %v1240_v7  ;;  %v1243_v13 = vadd.f32 %v1877_v14, %v2404_v5  ;;  %v1234_v34 = vpop.f32.mrb[43].mxu1 }
 0x465   : > { %v1358_v51 = vmul.f32 %v1311_v40, %v1232_v10  ;;  %v1235_v16 = vadd.f32 %v2404_v5, %v1234_v34 }
 0x466   : > { %v1361_v59 = vmul.f32 %v1317_v2, %v1243_v13  ;;  %v1376_v60 = vadd.f32 %v1360_v52, %v2292_v19 }
 0x467   : > { %v1359_v26 = vmul.f32 %v1313_v1, %v1235_v16  ;;  %v1374_v18 = vadd.f32 %v1358_v51, %v2288_v17 }
 0x468   : > { %v1377_v22 = vadd.f32 %v1361_v59, %v2295_v24 }
 0x469   : > { %v1375_v27 = vadd.f32 %v1359_v26, %v2298_v12  ;;  %v1880_v61 = vpop.f32.mrb[44].mxu1  ;;  %v1331_v12 = vpop.permute.xlu0 %1330 }
 0x46a   : > { %v1395_v20 = vpack.c.bf16 %v1377_v22, %v1376_v60  ;;  %v1256_v28 = vadd.f32 %v1880_v61, %v2404_v5  ;;  %v1247_v21 = vpop.f32.mrb[45].mxu1 }
 0x46b   : > { %v1394_v58 = vpack.c.bf16 %v1375_v27, %v1374_v18  ;;  %v1248_v56 = vadd.f32 %v2404_v5, %v1247_v21  ;;  %v1881_v0 = vpop.f32.mrb[46].mxu1 }
 0x46c   : > { %v1364_v55 = vmul.f32 %v1323_v9, %v1256_v28  ;;  %v1259_v19 = vadd.f32 %v1881_v0, %v2404_v5  ;;  %v1250_v37 = vpop.f32.mrb[47].mxu1 }
 0x46d   : > { %v1362_v24 = vmul.f32 %v1319_v43, %v1248_v56  ;;  %v1251_v39 = vadd.f32 %v2404_v5, %v1250_v37  ;;  %1894 = vmatprep.mubr.msk.bf16.mxu0 %vm642_vm3, %v1394_v58  ;;  %v1335_v43 = vpop.permute.xlu0 %1334 }
 0x46e   : > { %v1365_v17 = vmul.f32 %v1325_v25, %v1259_v19  ;;  %1895 = vmatmul.mubr.msk.bf16.vlgmr.msra.gmra.mrb[40].mxu0 %vm642_vm3, %v1395_v20  ;;  %v1380_v57 = vadd.f32 %v1364_v55, %v2317_v29 }
 0x46f   : > { %v1363_v4 = vmul.f32 %v1321_v3, %v1251_v39  ;;  %v1378_v46 = vadd.f32 %v1362_v24, %v2312_v45 }
 0x470   : > { %v1381_v42 = vadd.f32 %v1365_v17, %v2320_v47 }
 0x471   : > { %v1379_v48 = vadd.f32 %v1363_v4, %v2324_v32  ;;  %v1884_v33 = vpop.f32.mrb[48].mxu1  ;;  %v1337_v32 = vpop.permute.xlu1 %1336 }
 0x472   : > { %v1397_v38 = vpack.c.bf16 %v1381_v42, %v1380_v57  ;;  %v1272_v62 = vadd.f32 %v1884_v33, %v2404_v5  ;;  %v1263_v36 = vpop.f32.mrb[49].mxu1  ;;  %v1339_v25 = vpop.permute.xlu0 %1338 }
 0x473   : > { %v1396_v63 = vpack.c.bf16 %v1379_v48, %v1378_v46  ;;  %v1264_v40 = vadd.f32 %v2404_v5, %v1263_v36  ;;  %v1885_v1 = vpop.f32.mrb[50].mxu1 }
 0x474   : > { %v1368_v41 = vmul.f32 %v1331_v12, %v1272_v62  ;;  %v1275_v2 = vadd.f32 %v1885_v1, %v2404_v5  ;;  %v1266_v29 = vpop.f32.mrb[51].mxu1 }
 0x475   : > { %v1366_v47 = vmul.f32 %v1327_v35, %v1264_v40  ;;  %v1267_v3 = vadd.f32 %v2404_v5, %v1266_v29  ;;  %1898 = vmatprep.mubr.msk.bf16.mxu0 %vm642_vm3, %v1396_v63 }
 0x476   : > { %v1369_v45 = vmul.f32 %v1333_v44, %v1275_v2  ;;  %1899 = vmatmul.mubr.msk.bf16.gmra.mrb[44].mxu0 %vm642_vm3, %v1397_v38  ;;  %v1384_v7 = vadd.f32 %v1368_v41, %v2343_v50 }
 0x477   : > { %v1367_v6 = vmul.f32 %v1329_v30, %v1267_v3  ;;  %v1382_v9 = vadd.f32 %v1366_v47, %v2338_v11 }
 0x478   : > { %v1385_v8 = vadd.f32 %v1369_v45, %v2346_v15  ;;  %v1341_v15 = vpop.permute.xlu1 %1340 }
 0x479   : > { %v1383_v10 = vadd.f32 %v1367_v6, %v2350_v49  ;;  %v1888_v14 = vpop.f32.mrb[52].mxu1 }
 0x47a   : > { %v1399_v52 = vpack.c.bf16 %v1385_v8, %v1384_v7  ;;  %v1288_v13 = vadd.f32 %v1888_v14, %v2404_v5  ;;  %v1279_v34 = vpop.f32.mrb[53].mxu1 }
 0x47b   : > { %v1398_v51 = vpack.c.bf16 %v1383_v10, %v1382_v9  ;;  %v1280_v16 = vadd.f32 %v2404_v5, %v1279_v34  ;;  %v1889_v59 = vpop.f32.mrb[54].mxu1 }
 0x47c   : > { %v1372_v26 = vmul.f32 %v1339_v25, %v1288_v13  ;;  %v1291_v60 = vadd.f32 %v1889_v59, %v2404_v5  ;;  %v1282_v50 = vpop.f32.mrb[55].mxu1 }
 0x47d   : > { %v1370_v22 = vmul.f32 %v1335_v43, %v1280_v16  ;;  %v1283_v11 = vadd.f32 %v2404_v5, %v1282_v50  ;;  %1902 = vmatprep.mubr.msk.bf16.mxu0 %vm642_vm3, %v1398_v51  ;;  %v1693_v5 = vld [vmem:[%s2492_s2 + $0x6] ss:$0 sm:$0xff] }
 0x47e   : > { %v1373_v49 = vmul.f32 %v1341_v15, %v1291_v60  ;;  %1903 = vmatmul.mubr.msk.bf16.gmra.mrb[48].mxu0 %vm642_vm3, %v1399_v52  ;;  %v1388_v18 = vadd.f32 %v1372_v26, %v2369_v54 }
 0x47f   : > { %v1371_v35 = vmul.f32 %v1337_v32, %v1283_v11  ;;  %v1386_v61 = vadd.f32 %v1370_v22, %v2364_v23 }
 0x480   : > { %v1389_v27 = vadd.f32 %v1373_v49, %v2372_v31 }
 0x481   : > { %v1387_v20 = vadd.f32 %v1371_v35, %v2376_v53 }
 0x482   : > { %v1401_v28 = vpack.c.bf16 %v1389_v27, %v1388_v18 }
 0x483   : > { %v1400_v21 = vpack.c.bf16 %v1387_v20, %v1386_v61 }
 0x485   : > { %1906 = vmatprep.mubr.msk.bf16.mxu0 %vm642_vm3, %v1400_v21 }
 0x486   : > { %1907 = vmatmul.mubr.msk.bf16.gmra.mrb[52].mxu0 %vm642_vm3, %v1401_v28 }
 0x541   : > { %v1896_v23 = vpop.f32.mrb[40].mxu0 }
 0x542   : > { %v1486_v54 = vadd.f32 %v1896_v23, %v1693_v5  ;;  %v1477_v31 = vpop.f32.mrb[41].mxu0 }
 0x543   : > { %v1478_v53 = vadd.f32 %v1693_v5, %v1477_v31  ;;  %v1897_v30 = vpop.f32.mrb[42].mxu0 }
 0x544   : > { %1543 = vst.msk [vmem:[%s2453_s10 + $0x10] sm:$0xff] %vm1540_vm5, %v1486_v54  ;;  %v1489_v58 = vadd.f32 %v1897_v30, %v1693_v5  ;;  %v1480_v56 = vpop.f32.mrb[43].mxu0 }
 0x545   : > { %1541 = vst.msk [vmem:[%s2453_s10] sm:$0xff] %vm1540_vm5, %v1478_v53  ;;  %v1481_v0 = vadd.f32 %v1693_v5, %v1480_v56 }
 0x546   : > { %1544 = vst.msk [vmem:[%s2453_s10 + $0x18] sm:$0xff] %vm1540_vm5, %v1489_v58 }
 0x547   : > { %1542 = vst.msk [vmem:[%s2453_s10 + $0x8] sm:$0xff] %vm1540_vm5, %v1481_v0 }
 0x549   : > { %v1900_v55 = vpop.f32.mrb[44].mxu0 }
 0x54a   : > { %v1502_v19 = vadd.f32 %v1900_v55, %v1693_v5  ;;  %v1493_v37 = vpop.f32.mrb[45].mxu0 }
 0x54b   : > { %v1494_v24 = vadd.f32 %v1693_v5, %v1493_v37  ;;  %v1901_v39 = vpop.f32.mrb[46].mxu0 }
 0x54c   : > { %1547 = vst.msk [vmem:[%s2453_s10 + $0x30] sm:$0xff] %vm1540_vm5, %v1502_v19  ;;  %v1505_v17 = vadd.f32 %v1901_v39, %v1693_v5  ;;  %v1496_v12 = vpop.f32.mrb[47].mxu0 }
 0x54d   : > { %1545 = vst.msk [vmem:[%s2453_s10 + $0x20] sm:$0xff] %vm1540_vm5, %v1494_v24  ;;  %v1497_v4 = vadd.f32 %v1693_v5, %v1496_v12 }
 0x54e   : > { %1548 = vst.msk [vmem:[%s2453_s10 + $0x38] sm:$0xff] %vm1540_vm5, %v1505_v17 }
 0x54f   : > { %1546 = vst.msk [vmem:[%s2453_s10 + $0x28] sm:$0xff] %vm1540_vm5, %v1497_v4 }
 0x551   : > { %v1904_v57 = vpop.f32.mrb[48].mxu0 }
 0x552   : > { %v1518_v42 = vadd.f32 %v1904_v57, %v1693_v5  ;;  %v1509_v44 = vpop.f32.mrb[49].mxu0 }
 0x553   : > { %v1510_v46 = vadd.f32 %v1693_v5, %v1509_v44  ;;  %v1905_v48 = vpop.f32.mrb[50].mxu0 }
 0x554   : > { %1551 = vst.msk [vmem:[%s2453_s10 + $0x50] sm:$0xff] %vm1540_vm5, %v1518_v42  ;;  %v1521_v33 = vadd.f32 %v1905_v48, %v1693_v5  ;;  %v1512_v38 = vpop.f32.mrb[51].mxu0 }
 0x555   : > { %1549 = vst.msk [vmem:[%s2453_s10 + $0x40] sm:$0xff] %vm1540_vm5, %v1510_v46  ;;  %v1513_v62 = vadd.f32 %v1693_v5, %v1512_v38 }
 0x556   : > { %1552 = vst.msk [vmem:[%s2453_s10 + $0x58] sm:$0xff] %vm1540_vm5, %v1521_v33 }
 0x557   : > { %1550 = vst.msk [vmem:[%s2453_s10 + $0x48] sm:$0xff] %vm1540_vm5, %v1513_v62 }
 0x559   : > { %v1908_v36 = vpop.f32.mrb[52].mxu0 }
 0x55a   : > { %v1534_v63 = vadd.f32 %v1908_v36, %v1693_v5  ;;  %v1525_v40 = vpop.f32.mrb[53].mxu0 }
 0x55b   : > { %v1526_v1 = vadd.f32 %v1693_v5, %v1525_v40  ;;  %v1909_v41 = vpop.f32.mrb[54].mxu0 }
 0x55c   : > { %1555 = vst.msk [vmem:[%s2453_s10 + $0x70] sm:$0xff] %vm1540_vm5, %v1534_v63  ;;  %v1537_v2 = vadd.f32 %v1909_v41, %v1693_v5  ;;  %v1528_v29 = vpop.f32.mrb[55].mxu0 }
 0x55d   : > { %1553 = vst.msk [vmem:[%s2453_s10 + $0x60] sm:$0xff] %vm1540_vm5, %v1526_v1  ;;  %v1529_v43 = vadd.f32 %v1693_v5, %v1528_v29 }
 0x55e   : > { %1556 = vst.msk [vmem:[%s2453_s10 + $0x78] sm:$0xff] %vm1540_vm5, %v1537_v2 }
 0x55f   : > { %1554 = vst.msk [vmem:[%s2453_s10 + $0x68] sm:$0xff] %vm1540_vm5, %v1529_v43 }
 0x560 PF: > { %s13_s12 = sadd.s32 1, %s2014_s12  }
 0x561   : > { %p10_p4 = scmp.ge.s32.totalorder %s13_s12, 4  }
 0x563   :  { %12 = sbr.rel (!%p10_p4) target bundleno = 1 (0x1), region = 62 }

</bundles_post_ra>
